<compile_context>
chip_gen: v5e
topology: v5e:2x2
jax: 0.10.0
libtpu: 0.0.40
codegen_flags: <defaults>
</compile_context>

<pallas_src>
import jax
import jax.numpy as jnp
from jax.experimental import pallas as pl
from jax.experimental.pallas import tpu as pltpu


def _round_up(v, m):
    return ((v + m - 1) // m) * m


def _round_down(v, m):
    return (v // m) * m


def _noise_kernel(params_ref, x_ref, delta_ref, mask_ref, o_ref):
    """out = delta * mask + x * scale + offset, scale/offset constant per row."""
    p = params_ref[...]                      # (TM, 2) f32: col 0 = scale, col 1 = offset
    scale = p[:, 0:1]                        # (TM, 1) -> broadcasts across lanes
    offset = p[:, 1:2]
    x = x_ref[...].astype(jnp.float32)
    d = delta_ref[...].astype(jnp.float32)
    m = mask_ref[...].astype(jnp.float32)    # mask may arrive int8 / bool / f32
    o_ref[...] = (d * m + x * scale + offset).astype(o_ref.dtype)


def noise_func_forward(x, delta_x, mask, a, b, *, tile_budget_bytes=None):
    """Pallas equivalent of
         delta_x * mask + x * (1 + a.expand(x.size()) * 0.1) + b.expand(x.size()) * 0.1
    with a, b shaped (1, C, 1, 1) (4-D input) or (C, 1, 1) (3-D input).
    mask may be float / bool / int8 (cast to f32 in-kernel).  Output dtype is
    x.dtype; compute is f32.  `tile_budget_bytes` overrides the auto VMEM tile
    budget (testing hook for forcing multi-block grids at small shapes)."""
    orig_shape = x.shape
    if x.ndim == 3:                                  # (C, H, W) module variant
        x, delta_x, mask = x[None], delta_x[None], mask[None]
    N, C, H, W = x.shape

    # Lane-dense flattening: contiguous NCHW -> (N*C, H*W) 2-D view (free).
    R, L = N * C, H * W
    x2 = x.reshape(R, L)
    d2 = delta_x.reshape(R, L)
    m2 = mask.reshape(R, L)

    # Hoist per-channel scalar math out of the kernel; fuse into one (R, 2)
    # per-row parameter stream: [:, 0] = 1 + 0.1*a, [:, 1] = 0.1*b.
    a_vec = jnp.asarray(a, jnp.float32).reshape(-1)              # (C,)
    b_vec = jnp.asarray(b, jnp.float32).reshape(-1)              # (C,)
    scale_rows = jnp.broadcast_to((1.0 + 0.1 * a_vec)[None, :], (N, C)).reshape(R, 1)
    offset_rows = jnp.broadcast_to((0.1 * b_vec)[None, :], (N, C)).reshape(R, 1)
    params = jnp.concatenate([scale_rows, offset_rows], axis=1)  # (R, 2) f32

    # ---- generation-aware VMEM budget ------------------------------------------
    try:
        vmem_cap = int(pltpu.get_tpu_info().vmem_capacity_bytes)
    except Exception:
        vmem_cap = 128 << 20                         # v5e/v6e-class fallback
    # v7x (64 MiB/TC) -> 48 MiB limit; v5e/v6e (128 MiB) -> 80 MiB limit.
    vmem_limit = max(32 << 20, min(80 << 20, (vmem_cap * 3) // 4))
    budget = (vmem_limit * 3) // 4                   # headroom for compiler scratch
    if tile_budget_bytes is not None:
        budget = int(tile_budget_bytes)              # tiling-only override (testing)

    # ---- tile sizing -------------------------------------------------------------
    # Footprint model (bytes): 2 pipeline buffers x 4 streams (x, delta, mask,
    # out — all counted at f32 width, conservative for narrow masks) of
    # tm x TL_pad, plus the lane-padded (tm, 2) -> (tm, 128) param slab (x2).
    def footprint(tm, tl_pad):
        return 32 * tm * tl_pad + 1024 * tm

    itemsize = min(x2.dtype.itemsize, d2.dtype.itemsize, m2.dtype.itemsize)
    SUB = 8 if itemsize >= 4 else 32                 # sublane-aligned rows (int8/bf16 safe)

    L_pad = _round_up(L, 128)
    if footprint(SUB, L_pad) <= budget:
        TL = L                                       # full-row, lane-dense blocks
    else:                                            # huge H*W: split the lane dim
        TL = _round_down(max((budget - 1024 * SUB) // (32 * SUB), 128), 128)
        if TL >= L:
            TL = L
    TL_pad = _round_up(TL, 128)

    tm = budget // (32 * TL_pad + 1024)
    if tm >= R:
        tm = R                                       # full first dim: always legal
    else:
        tm = max(SUB, _round_down(tm, SUB))

    # ---- grid balance: keep >=2 (>=8 for big problems) steps so v7x's second
    # TensorCore isn't idle and the DMA pipeline has work to overlap. -------------
    stream_bytes = R * L * 4
    if stream_bytes > (4 << 20):
        min_steps = 8 if stream_bytes > (32 << 20) else 2
        row_steps, lane_steps = pl.cdiv(R, tm), pl.cdiv(L, TL)
        if row_steps * lane_steps < min_steps:
            want_rows = -(-min_steps // lane_steps)
            tm_cap = _round_down(R // want_rows, SUB)
            if tm_cap >= SUB:
                tm = min(tm, tm_cap)
                row_steps = pl.cdiv(R, tm)
        if row_steps * lane_steps < min_steps and TL > 128:
            want_lanes = -(-min_steps // row_steps)
            new_tl = _round_down(max(-(-L // want_lanes), 128), 128)
            TL = min(TL, new_tl)
            TL_pad = _round_up(TL, 128)

    row_steps, lane_steps = pl.cdiv(R, tm), pl.cdiv(L, TL)
    grid = (row_steps, lane_steps)

    tile_spec = pl.BlockSpec((tm, TL), lambda i, j: (i, j))
    param_spec = pl.BlockSpec((tm, 2), lambda i, j: (i, 0))

    out2 = pl.pallas_call(
        _noise_kernel,
        out_shape=jax.ShapeDtypeStruct((R, L), x.dtype),
        grid=grid,
        in_specs=[param_spec, tile_spec, tile_spec, tile_spec],
        out_specs=tile_spec,
        compiler_params=pltpu.CompilerParams(
            dimension_semantics=("parallel", "parallel"),
            vmem_limit_bytes=vmem_limit,
        ),
    )(params, x2, d2, m2)

    return out2.reshape(orig_shape)


def _reference(x, delta_x, mask, a, b):
    # Pure-JAX reference of the PyTorch expression (mask cast like the kernel).
    return (delta_x * mask.astype(jnp.float32)
            + x * (1.0 + a * 0.1) + b * 0.1).astype(x.dtype)


# TODO(synk): the a/b-is-None branch (per-target-model dict outputs, NaN checks
# and register_hook gradient taps) is Python/autograd bookkeeping around the
# same elementwise add — no distinct Pallas kernel; update_func's clamp is a
# host-side jnp.clip on the (1,3,1,1) params, not worth a kernel.

if __name__ == "__main__":
    key = jax.random.PRNGKey(0)

    C = 3                                # module pins a/b to 3 channels
    a_init, b_init = 0.5, -0.25
    a4 = jnp.zeros((1, C, 1, 1), jnp.float32) + a_init
    b4 = jnp.zeros((1, C, 1, 1), jnp.float32) + b_init

    # --- case 1: small 4-D input, f32 mask, PGD-style delta_x -------------------
    shape1 = (2, C, 16, 16)
    k_x, k_d, k_m, key = jax.random.split(key, 4)
    x1 = jax.random.normal(k_x, shape1, dtype=jnp.float32)
    delta1 = jnp.zeros(shape1, jnp.float32) + \
        jax.random.uniform(k_d, shape1, dtype=jnp.float32) * 1e-4
    mask1 = (jax.random.uniform(k_m, shape1) > 0.5).astype(jnp.float32)
    out1 = jax.block_until_ready(noise_func_forward(x1, delta1, mask1, a4, b4))
    ref1 = _reference(x1, delta1, mask1, a4, b4)
    assert out1.shape == ref1.shape and out1.dtype == ref1.dtype
    assert jnp.allclose(out1, ref1, atol=1e-6, rtol=1e-6)

    # --- case 2: 3-D (C, H, W) input with (C,1,1)-shaped params, int8 mask ------
    a3 = jnp.zeros((C, 1, 1), jnp.float32) + a_init
    b3 = jnp.zeros((C, 1, 1), jnp.float32) + b_init
    shape2 = (C, 32, 48)
    k_x, k_d, k_m, key = jax.random.split(key, 4)
    x2 = jax.random.normal(k_x, shape2, dtype=jnp.float32)
    delta2 = jax.random.uniform(k_d, shape2, dtype=jnp.float32) * 1e-4
    mask2 = (jax.random.uniform(k_m, shape2) > 0.5).astype(jnp.int8)
    out2 = jax.block_until_ready(noise_func_forward(x2, delta2, mask2, a3, b3))
    ref2 = _reference(x2, delta2, mask2.astype(jnp.float32), a3, b3)
    assert out2.shape == ref2.shape and out2.dtype == ref2.dtype
    assert jnp.allclose(out2, ref2, atol=1e-6, rtol=1e-6)

    # --- case 3: forced tiny tile budget -> multi-step 2-D grid with partial
    # blocks on both axes and a non-128-multiple lane dim (masked-store path) ----
    shape3 = (12, C, 56, 72)             # H*W = 4032 (not a 128 multiple), R = 36
    k_x, k_d, k_m, key = jax.random.split(key, 4)
    x3 = jax.random.normal(k_x, shape3, dtype=jnp.float32)
    delta3 = jax.random.uniform(k_d, shape3, dtype=jnp.float32) * 1e-4
    mask3 = (jax.random.uniform(k_m, shape3) > 0.5).astype(jnp.int8)
    out3 = jax.block_until_ready(
        noise_func_forward(x3, delta3, mask3, a4, b4, tile_budget_bytes=128 << 10))
    ref3 = _reference(x3, delta3, mask3.astype(jnp.float32), a4, b4)
    assert jnp.allclose(out3, ref3, atol=1e-6, rtol=1e-6)

    print("KERNEL_OK")
</pallas_src>

<mosaic_0001>
module attributes {stable_mosaic.version = 11 : i64} {
  func.func @_noise_kernel(%arg0: i32, %arg1: i32, %arg2: memref<6x2xf32, #tpu.memory_space<vmem>>, %arg3: memref<6x256xf32, #tpu.memory_space<vmem>>, %arg4: memref<6x256xf32, #tpu.memory_space<vmem>>, %arg5: memref<6x256xf32, #tpu.memory_space<vmem>>, %arg6: memref<6x256xf32, #tpu.memory_space<vmem>>) attributes {dimension_semantics = [#tpu.dimension_semantics<parallel>, #tpu.dimension_semantics<parallel>], iteration_bounds = array<i64: 1, 1>, scalar_prefetch = 0 : i64, scratch_operands = 0 : i64, tpu.core_type = #tpu.core_type<tc>, window_params = [{transform_indices = @transform_0, window_bounds = array<i64: 6, 2>}, {transform_indices = @transform_1, window_bounds = array<i64: 6, 256>}, {transform_indices = @transform_2, window_bounds = array<i64: 6, 256>}, {transform_indices = @transform_3, window_bounds = array<i64: 6, 256>}, {transform_indices = @transform_4, window_bounds = array<i64: 6, 256>}]} {
    %c0 = arith.constant 0 : index
    %c0_0 = arith.constant 0 : index
    %0 = vector.load %arg2[%c0, %c0_0] : memref<6x2xf32, #tpu.memory_space<vmem>>, vector<6x2xf32>
    %1 = vector.extract_strided_slice %0 {offsets = [0, 0], sizes = [6, 1], strides = [1, 1]} : vector<6x2xf32> to vector<6x1xf32>
    %2 = vector.extract_strided_slice %0 {offsets = [0, 1], sizes = [6, 1], strides = [1, 1]} : vector<6x2xf32> to vector<6x1xf32>
    %c0_1 = arith.constant 0 : index
    %c0_2 = arith.constant 0 : index
    %3 = vector.load %arg3[%c0_1, %c0_2] : memref<6x256xf32, #tpu.memory_space<vmem>>, vector<6x256xf32>
    %c0_3 = arith.constant 0 : index
    %c0_4 = arith.constant 0 : index
    %4 = vector.load %arg4[%c0_3, %c0_4] : memref<6x256xf32, #tpu.memory_space<vmem>>, vector<6x256xf32>
    %c0_5 = arith.constant 0 : index
    %c0_6 = arith.constant 0 : index
    %5 = vector.load %arg5[%c0_5, %c0_6] : memref<6x256xf32, #tpu.memory_space<vmem>>, vector<6x256xf32>
    %6 = arith.mulf %4, %5 : vector<6x256xf32>
    %7 = vector.broadcast %1 : vector<6x1xf32> to vector<6x256xf32>
    %8 = arith.mulf %3, %7 : vector<6x256xf32>
    %9 = arith.addf %6, %8 : vector<6x256xf32>
    %10 = vector.broadcast %2 : vector<6x1xf32> to vector<6x256xf32>
    %11 = arith.addf %9, %10 : vector<6x256xf32>
    %c0_7 = arith.constant 0 : index
    %c0_8 = arith.constant 0 : index
    %12 = vector.load %arg6[%c0_7, %c0_8] : memref<6x256xf32, #tpu.memory_space<vmem>>, vector<6x256xf32>
    tpu.vector_store %arg6[%c0_7, %c0_8], %11 {strides = array<i32>} : memref<6x256xf32, #tpu.memory_space<vmem>>, vector<6x256xf32>,
    return
  }
  func.func @transform_0(%arg0: i32, %arg1: i32) -> (i32, i32) {
    %c0_i32 = arith.constant 0 : i32
    %c0_i32_0 = arith.constant 0 : i32
    return %arg0, %c0_i32 : i32, i32
  }
  func.func @transform_1(%arg0: i32, %arg1: i32) -> (i32, i32) {
    %c0_i32 = arith.constant 0 : i32
    return %arg0, %arg1 : i32, i32
  }
  func.func @transform_2(%arg0: i32, %arg1: i32) -> (i32, i32) {
    %c0_i32 = arith.constant 0 : i32
    return %arg0, %arg1 : i32, i32
  }
  func.func @transform_3(%arg0: i32, %arg1: i32) -> (i32, i32) {
    %c0_i32 = arith.constant 0 : i32
    return %arg0, %arg1 : i32, i32
  }
  func.func @transform_4(%arg0: i32, %arg1: i32) -> (i32, i32) {
    %c0_i32 = arith.constant 0 : i32
    return %arg0, %arg1 : i32, i32
  }
}

</mosaic_0001>

<bundles_post_ra>
// kernel: tpu_custom_call.1
= control target key start
LH: loop header
LB: loop body
LE: loop exit
PB: predicated region body
PF: predicated region fallthrough
CT: control target
= control target key end

     0   :  { %9 = vsyncpa [#allocation3], 0  ;;  %s259_s0 = inlined_call_operand.vmem [shape: f32[6,2], index: 0, kind: input, shape index: {}]   ;;  %s260_s1 = inlined_call_operand.hbm [shape: f32[6,256], index: 1, kind: input, shape index: {}]   ;;  %s261_s2 = inlined_call_operand.hbm [shape: f32[6,256], index: 2, kind: input, shape index: {}]   ;;  %s262_s3 = inlined_call_operand.hbm [shape: f32[6,256], index: 3, kind: input, shape index: {}]   ;;  %s263_s4 = inlined_call_operand.hbm [shape: f32[6,256], index: 4, kind: output, shape index: {}]  }
   0x1   :  { %10 = vsyncpa [#allocation6], 0  ;;  %s30_s17 = sshll.u32 %s261_s2, 4  ;;  %s31_s17 = int_to_ptr.hbm [resolvable:$true] %s30_s17 }
   0x2   :  { %11 = vsyncpa [#allocation4], 0  ;;  %s213_s18 = smov [#allocation5]   ;;  %s19_s22 = sshll.u32 %s260_s1, 4  ;;  %s20_s22 = int_to_ptr.hbm [resolvable:$true] %s19_s22 }
   0x3   :  { %s32_s19 = sshll.u32 %s213_s18, 4  ;;  %s214_s23 = smov [#allocation2]   ;;  %s33_s19 = int_to_ptr.vmem [resolvable:$true] %s32_s19 }
   0x4   :  { %35 = dma.hbm_to_vmem [thread:$0]  %s31_s17, 256, %s33_s19, [#allocation6]  }
   0x5   :  { %s21_s24 = sshll.u32 %s214_s23, 4  ;;  %s41_s27 = sshll.u32 %s262_s3, 4  ;;  %s22_s24 = int_to_ptr.vmem [resolvable:$true] %s21_s24  ;;  %s42_s27 = int_to_ptr.hbm [resolvable:$true] %s41_s27 }
   0x6   :  { %24 = dma.hbm_to_vmem [thread:$0]  %s20_s22, 256, %s22_s24, [#allocation3]  }
   0x7   :  { %s215_s2 = smov [#allocation7]  }
   0x8   :  { %s43_s28 = sshll.u32 %s215_s2, 4  ;;  %s44_s28 = int_to_ptr.vmem [resolvable:$true] %s43_s28 }
   0x9   :  { %46 = dma.hbm_to_vmem [thread:$0]  %s42_s27, 256, %s44_s28, [#allocation6]  }
   0xa   :  { %207 = dma.done.wait [#allocation3], 256  }
   0xb   :  { %208 = vsyncadd [#allocation3], 4294967040 }
   0xc   :  { %209 = dma.done.wait [#allocation6], 512  }
   0xd   :  { %210 = vsyncadd [#allocation6], 4294966784  ;;  %v216_v0 = vmov 0   ;;  %v59_v1 = vld [vmem:[%s259_s0] sm:$0x3f]  ;;  %v217_v2 = vmov 1  }
   0xe   :  { %109 = vset.pattern.permute.xlu0 %v216_v0  ;;  %v60_v3 = vld [vmem:[#allocation2] sm:$0x3f]  ;;  %v61_v4 = vld [vmem:[#allocation2 + $0x8] sm:$0x3f]  ;;  %v62_v6 = vld [vmem:[#allocation5] sm:$0x3f] }
   0xf   :  { %70 = vperm.xlu0 %109, %v59_v1   ;;  %v63_v7 = vld [vmem:[#allocation5 + $0x8] sm:$0x3f]  ;;  %v64_v8 = vld [vmem:[#allocation7] sm:$0x3f]  ;;  %v65_v9 = vld [vmem:[#allocation7 + $0x8] sm:$0x3f] }
  0x10   :  { %v66_v12 = vmul.f32 %v64_v8, %v62_v6  ;;  %v67_v13 = vmul.f32 %v65_v9, %v63_v7  ;;  %s218_s3 = smov [#allocation8]   ;;  %s92_s6 = sshll.u32 %s263_s4, 4  ;;  %s93_s6 = int_to_ptr.hbm [resolvable:$true] %s92_s6 }
  0x11   :  { %s90_s30 = sshll.u32 %s218_s3, 4  ;;  %s91_s30 = int_to_ptr.vmem [resolvable:$true] %s90_s30 }
  0x17   :  { %110 = vset.pattern.permute.xlu0 %v217_v2 }
  0x18   :  { %78 = vperm.xlu0 %110, %v59_v1  }
  0x81   :  { %v71_v5 = vpop.permute.xlu0 %70 }
  0x82   :  { %v73_v10 = vmul.f32 %v71_v5, %v60_v3  ;;  %v74_v11 = vmul.f32 %v71_v5, %v61_v4 }
  0x84   :  { %v75_v14 = vadd.f32 %v73_v10, %v66_v12  ;;  %v76_v15 = vadd.f32 %v74_v11, %v67_v13 }
  0x8a   :  { %v79_v16 = vpop.permute.xlu0 %78 }
  0x8b   :  { %v81_v17 = vadd.f32 %v79_v16, %v75_v14  ;;  %v82_v18 = vadd.f32 %v79_v16, %v76_v15 }
  0x8d   :  { %83 = vst [vmem:[#allocation8] sm:$0x3f] %v81_v17 }
  0x8e   :  { %84 = vst [vmem:[#allocation8 + $0x8] sm:$0x3f] %v82_v18 }
  0x8f   :  { %95 = dma.vmem_to_hbm [thread:$0]  %s91_s30, 256, %s93_s6, [#allocation4]  }
  0x90   :  { %211 = dma.done.wait [#allocation4], 256  }
  0x91   :  { %212 = vsyncadd [#allocation4], 4294967040 }
  0x92   :  { %100 = vsyncpa [#allocation3], 1 }
  0x93   :  { %101 = vsyncpa [#allocation6], 1 }
  0x94   :  { %102 = vsyncpa [#allocation4], 1 }

</bundles_post_ra>
